<compile_context>
chip_gen: v6e
topology: v6e:2x2x1
jax: 0.10.0
libtpu: 0.0.40
codegen_flags: <defaults>
</compile_context>

<pallas_src>
import functools

import jax
import jax.numpy as jnp
from jax import lax
from jax.experimental import pallas as pl
from jax.experimental.pallas import tpu as pltpu


def _leaky(x, slope):
    return jnp.where(x >= 0, x, slope * x)


def _vmem_limit_bytes(needed):
    # Generous headroom over blocks + scratch, clamped to a value safe on
    # v5e / v6e (128 MiB physical) and v7x (64 MiB physical).
    return int(min(max(4 * needed, 32 * 1024 * 1024), 64 * 1024 * 1024))


# --------------------------------------------------------------------------
# Kernel 1: ConvTranspose2d(k=2, s=2) = per-pixel channel matmul -> 4*Cout
# --------------------------------------------------------------------------
def upconv_kernel(x_ref, w_ref, b_ref, o_ref, *, H, W, cin, cout4):
    # x_ref: (1, H, W, cin); w_ref: (cin, 4*cout); b_ref: (1, 4*cout)
    x = x_ref[0].reshape(H * W, cin)
    y = jnp.dot(x, w_ref[...], preferred_element_type=jnp.float32) + b_ref[...]
    o_ref[0] = y.reshape(H, W, cout4)


def conv_transpose_up(x_nhwc, wt, bt):
    # wt: PyTorch ConvTranspose2d weight (Cin, Cout, 2, 2); bt: (Cout,)
    N, H, W, Cin = x_nhwc.shape
    Cout = wt.shape[1]
    # out[n, 2i+ki, 2j+kj, co] = sum_ci x[n,i,j,ci] * wt[ci,co,ki,kj] + bt[co]
    w4 = jnp.transpose(wt, (0, 2, 3, 1)).reshape(Cin, 4 * Cout)  # cols=(ki,kj,co)
    b4 = jnp.tile(bt, 4).reshape(1, 4 * Cout)

    block_bytes = 4 * (H * W * Cin + Cin * 4 * Cout + 4 * Cout + H * W * 4 * Cout)
    cost = pl.CostEstimate(
        flops=2 * N * H * W * Cin * 4 * Cout,
        transcendentals=0,
        bytes_accessed=4 * (N * H * W * (Cin + 4 * Cout) + Cin * 4 * Cout),
    )

    kern = functools.partial(upconv_kernel, H=H, W=W, cin=Cin, cout4=4 * Cout)
    out4 = pl.pallas_call(
        kern,
        out_shape=jax.ShapeDtypeStruct((N, H, W, 4 * Cout), jnp.float32),
        grid=(N,),
        in_specs=[
            pl.BlockSpec((1, H, W, Cin), lambda n: (n, 0, 0, 0)),
            pl.BlockSpec((Cin, 4 * Cout), lambda n: (0, 0)),
            pl.BlockSpec((1, 4 * Cout), lambda n: (0, 0)),
        ],
        out_specs=pl.BlockSpec((1, H, W, 4 * Cout), lambda n: (n, 0, 0, 0)),
        compiler_params=pltpu.CompilerParams(
            dimension_semantics=("parallel",),
            vmem_limit_bytes=_vmem_limit_bytes(2 * block_bytes),
        ),
        cost_estimate=cost,
    )(x_nhwc, w4, b4)

    # 2x2 sub-pixel interleave -> (N, 2H, 2W, Cout) (single thin XLA pass).
    out = out4.reshape(N, H, W, 2, 2, Cout)
    out = jnp.transpose(out, (0, 1, 3, 2, 4, 5)).reshape(N, 2 * H, 2 * W, Cout)
    return out


# --------------------------------------------------------------------------
# Kernel 2: fused UNetConvBlock (downsample=False, use_fin=False) with the
# channel concat and the spatial padding fused in:
#   x  = cat([up, bridge], C)      (never materialized in HBM)
#   y  = lrelu(conv3x3(x)); y = lrelu(conv3x3(y)); y += conv1x1(x)
# --------------------------------------------------------------------------
def conv_block_kernel(up_ref, br_ref, w1u_ref, w1b_ref, b1_ref,
                      w2_ref, b2_ref, widu_ref, widb_ref, bid_ref,
                      o_ref, upad_ref, bpad_ref, y1pad_ref,
                      *, OH, OW, cup, cbr, cout, slope):
    f32 = jnp.float32

    # Zero only the 1-pixel halo of the padded VMEM scratch buffers.  The
    # interiors are fully overwritten every grid step; the halo provides the
    # zero 'same' padding for the two 3x3 convs.  (Done every step so it is
    # also safe when the parallel batch axis is split across TensorCores.)
    for ref, c in ((upad_ref, cup), (bpad_ref, cbr), (y1pad_ref, cout)):
        zrow = jnp.zeros((1, OW + 2, c), f32)
        zcol = jnp.zeros((OH + 2, 1, c), f32)
        ref[0:1, :, :] = zrow
        ref[OH + 1:OH + 2, :, :] = zrow
        ref[:, 0:1, :] = zcol
        ref[:, OW + 1:OW + 2, :] = zcol

    # Stage the (already interleaved) upsampled tensor and the bridge into the
    # padded scratch.  The channel concat is fused by splitting the weights.
    upad_ref[1:OH + 1, 1:OW + 1, :] = up_ref[0]
    bpad_ref[1:OH + 1, 1:OW + 1, :] = br_ref[0]

    # ---- conv_1 (3x3, pad 1, Cin = cup + cbr) + bias + LeakyReLU ----
    acc = jnp.zeros((OH * OW, cout), f32)
    for k in range(9):
        dy, dx = divmod(k, 3)
        pu = upad_ref[dy:dy + OH, dx:dx + OW, :].reshape(OH * OW, cup)
        pb = bpad_ref[dy:dy + OH, dx:dx + OW, :].reshape(OH * OW, cbr)
        acc = acc + jnp.dot(pu, w1u_ref[k], preferred_element_type=f32)
        acc = acc + jnp.dot(pb, w1b_ref[k], preferred_element_type=f32)
    y1 = _leaky(acc + b1_ref[...], slope)

    # Re-pad the intermediate activation (interior store only; halo stays 0).
    y1pad_ref[1:OH + 1, 1:OW + 1, :] = y1.reshape(OH, OW, cout)

    # ---- conv_2 (3x3, pad 1) + bias + LeakyReLU ----
    acc2 = jnp.zeros((OH * OW, cout), f32)
    for k in range(9):
        dy, dx = divmod(k, 3)
        p = y1pad_ref[dy:dy + OH, dx:dx + OW, :].reshape(OH * OW, cout)
        acc2 = acc2 + jnp.dot(p, w2_ref[k], preferred_element_type=f32)
    y2 = _leaky(acc2 + b2_ref[...], slope)

    # ---- identity 1x1 conv on cat(up, bridge) + residual add ----
    xu = up_ref[0].reshape(OH * OW, cup)
    xb = br_ref[0].reshape(OH * OW, cbr)
    ident = (jnp.dot(xu, widu_ref[...], preferred_element_type=f32)
             + jnp.dot(xb, widb_ref[...], preferred_element_type=f32)
             + bid_ref[...])

    o_ref[0] = (y2 + ident).reshape(OH, OW, cout)


def conv_block(up_nhwc, bridge_nhwc, params, slope):
    N, OH, OW, Cup = up_nhwc.shape
    Cbr = bridge_nhwc.shape[-1]
    Cin = Cup + Cbr
    Cout = params["w1"].shape[0]          # torch Conv2d weight: (O, I, kH, kW)

    # Weight re-layout: w[k=kh*3+kw, ci, co] = W[co, ci, kh, kw], with the
    # input-channel dim split into the (up, bridge) halves of the concat.
    w1 = jnp.transpose(params["w1"], (2, 3, 1, 0)).reshape(9, Cin, Cout)
    w1u, w1b = w1[:, :Cup, :], w1[:, Cup:, :]
    w2 = jnp.transpose(params["w2"], (2, 3, 1, 0)).reshape(9, Cout, Cout)
    wid = jnp.transpose(params["wid"][:, :, 0, 0], (1, 0))       # (Cin, Cout)
    widu, widb = wid[:Cup, :], wid[Cup:, :]
    b1 = params["b1"].reshape(1, Cout)
    b2 = params["b2"].reshape(1, Cout)
    bid = params["bid"].reshape(1, Cout)

    block_bytes = 4 * (OH * OW * (Cin + Cout)
                       + 3 * (OH + 2) * (OW + 2) * max(Cup, Cbr, Cout)
                       + 9 * Cin * Cout + 9 * Cout * Cout + Cin * Cout)
    cost = pl.CostEstimate(
        flops=2 * N * OH * OW * (9 * Cin * Cout + 9 * Cout * Cout + Cin * Cout),
        transcendentals=0,
        bytes_accessed=4 * (N * OH * OW * (Cin + Cout)
                            + 9 * Cin * Cout + 9 * Cout * Cout + Cin * Cout),
    )

    kern = functools.partial(conv_block_kernel, OH=OH, OW=OW, cup=Cup, cbr=Cbr,
                             cout=Cout, slope=slope)
    out = pl.pallas_call(
        kern,
        out_shape=jax.ShapeDtypeStruct((N, OH, OW, Cout), jnp.float32),
        grid=(N,),
        in_specs=[
            pl.BlockSpec((1, OH, OW, Cup), lambda n: (n, 0, 0, 0)),
            pl.BlockSpec((1, OH, OW, Cbr), lambda n: (n, 0, 0, 0)),
            pl.BlockSpec((9, Cup, Cout), lambda n: (0, 0, 0)),
            pl.BlockSpec((9, Cbr, Cout), lambda n: (0, 0, 0)),
            pl.BlockSpec((1, Cout), lambda n: (0, 0)),
            pl.BlockSpec((9, Cout, Cout), lambda n: (0, 0, 0)),
            pl.BlockSpec((1, Cout), lambda n: (0, 0)),
            pl.BlockSpec((Cup, Cout), lambda n: (0, 0)),
            pl.BlockSpec((Cbr, Cout), lambda n: (0, 0)),
            pl.BlockSpec((1, Cout), lambda n: (0, 0)),
        ],
        out_specs=pl.BlockSpec((1, OH, OW, Cout), lambda n: (n, 0, 0, 0)),
        scratch_shapes=[
            pltpu.VMEM((OH + 2, OW + 2, Cup), jnp.float32),
            pltpu.VMEM((OH + 2, OW + 2, Cbr), jnp.float32),
            pltpu.VMEM((OH + 2, OW + 2, Cout), jnp.float32),
        ],
        compiler_params=pltpu.CompilerParams(
            dimension_semantics=("parallel",),
            vmem_limit_bytes=_vmem_limit_bytes(2 * block_bytes),
        ),
        cost_estimate=cost,
    )(up_nhwc, bridge_nhwc, w1u, w1b, b1, w2, b2, widu, widb, bid)
    return out


# --------------------------------------------------------------------------
# UNetUpBlock forward (NCHW in / NCHW out, matching PyTorch)
# --------------------------------------------------------------------------
def unet_up_block(x_nchw, bridge_nchw, params, relu_slope):
    x = jnp.transpose(x_nchw, (0, 2, 3, 1))             # NCHW -> NHWC
    bridge = jnp.transpose(bridge_nchw, (0, 2, 3, 1))
    up = conv_transpose_up(x, params["up_w"], params["up_b"])
    y = conv_block(up, bridge, params, relu_slope)       # concat fused in-kernel
    return jnp.transpose(y, (0, 3, 1, 2))                # NHWC -> NCHW


# --------------------------------------------------------------------------
# Pure-JAX (XLA) reference, NCHW, for a correctness check
# --------------------------------------------------------------------------
def unet_up_block_ref(x, bridge, params, slope):
    N, Cin, H, W = x.shape
    Cout = params["up_w"].shape[1]
    y = jnp.zeros((N, Cout, 2 * H, 2 * W), jnp.float32)
    for ki in range(2):
        for kj in range(2):
            contrib = jnp.einsum("nchw,cd->ndhw", x, params["up_w"][:, :, ki, kj],
                                 precision=lax.Precision.HIGHEST)
            y = y.at[:, :, ki::2, kj::2].set(contrib)
    y = y + params["up_b"][None, :, None, None]
    y = jnp.concatenate([y, bridge], axis=1)

    def conv2d(z, w, b, pad):
        r = lax.conv_general_dilated(z, w, (1, 1), ((pad, pad), (pad, pad)),
                                     dimension_numbers=("NCHW", "OIHW", "NCHW"),
                                     precision=lax.Precision.HIGHEST)
        return r + b[None, :, None, None]

    y1 = _leaky(conv2d(y, params["w1"], params["b1"], 1), slope)
    y2 = _leaky(conv2d(y1, params["w2"], params["b2"], 1), slope)
    ident = conv2d(y, params["wid"], params["bid"], 0)
    return y2 + ident


if __name__ == "__main__":
    key = jax.random.PRNGKey(0)
    ks = jax.random.split(key, 10)

    N, CIN, COUT = 2, 8, 4        # UNetUpBlock(in_channels=8, out_channels=4)
    H, W = 8, 8                   # input spatial; output is 2H x 2W
    RELU_SLOPE = 0.2

    params = {
        # ConvTranspose2d(CIN, COUT, k=2, s=2): weight (CIN, COUT, 2, 2)
        "up_w": 0.1 * jax.random.normal(ks[0], (CIN, COUT, 2, 2), jnp.float32),
        "up_b": 0.1 * jax.random.normal(ks[1], (COUT,), jnp.float32),
        # conv_1: Conv2d(CIN, COUT, 3, 1, 1)
        "w1": 0.1 * jax.random.normal(ks[2], (COUT, CIN, 3, 3), jnp.float32),
        "b1": 0.1 * jax.random.normal(ks[3], (COUT,), jnp.float32),
        # conv_2: Conv2d(COUT, COUT, 3, 1, 1)
        "w2": 0.1 * jax.random.normal(ks[4], (COUT, COUT, 3, 3), jnp.float32),
        "b2": 0.1 * jax.random.normal(ks[5], (COUT,), jnp.float32),
        # identity: Conv2d(CIN, COUT, 1, 1, 0)
        "wid": 0.1 * jax.random.normal(ks[6], (COUT, CIN, 1, 1), jnp.float32),
        "bid": 0.1 * jax.random.normal(ks[7], (COUT,), jnp.float32),
    }

    x = jax.random.normal(ks[8], (N, CIN, H, W), jnp.float32)
    bridge = jax.random.normal(ks[9], (N, CIN - COUT, 2 * H, 2 * W), jnp.float32)

    out = jax.block_until_ready(unet_up_block(x, bridge, params, RELU_SLOPE))
    ref = jax.block_until_ready(unet_up_block_ref(x, bridge, params, RELU_SLOPE))

    assert out.shape == (N, COUT, 2 * H, 2 * W), out.shape
    max_err = float(jnp.max(jnp.abs(out - ref)))
    assert jnp.allclose(out, ref, atol=2e-2, rtol=2e-2), f"max_err={max_err}"
    print("KERNEL_OK")
</pallas_src>

<mosaic_0001>
module attributes {stable_mosaic.version = 11 : i64} {
  func.func @upconv_kernel(%arg0: i32, %arg1: memref<1x8x8x8xf32, #tpu.memory_space<vmem>>, %arg2: memref<8x16xf32, #tpu.memory_space<vmem>>, %arg3: memref<1x16xf32, #tpu.memory_space<vmem>>, %arg4: memref<1x8x8x16xf32, #tpu.memory_space<vmem>>) attributes {dimension_semantics = [#tpu.dimension_semantics<parallel>], iteration_bounds = array<i64: 2>, scalar_prefetch = 0 : i64, scratch_operands = 0 : i64, tpu.core_type = #tpu.core_type<tc>, window_params = [{transform_indices = @transform_0, window_bounds = array<i64: 1, 8, 8, 8>}, {pipeline_mode = #tpu.pipeline_mode<synchronous>, transform_indices = @transform_1, window_bounds = array<i64: 8, 16>}, {pipeline_mode = #tpu.pipeline_mode<synchronous>, transform_indices = @transform_2, window_bounds = array<i64: 1, 16>}, {transform_indices = @transform_3, window_bounds = array<i64: 1, 8, 8, 16>}]} {
    %c0 = arith.constant 0 : index
    %c0_0 = arith.constant 0 : index
    %c0_1 = arith.constant 0 : index
    %c0_2 = arith.constant 0 : index
    %0 = vector.load %arg1[%c0, %c0_0, %c0_1, %c0_2] : memref<1x8x8x8xf32, #tpu.memory_space<vmem>>, vector<1x8x8x8xf32>
    %1 = vector.shape_cast %0 : vector<1x8x8x8xf32> to vector<8x8x8xf32>
    %2 = vector.shape_cast %1 : vector<8x8x8xf32> to vector<64x8xf32>
    %c0_3 = arith.constant 0 : index
    %c0_4 = arith.constant 0 : index
    %3 = vector.load %arg2[%c0_3, %c0_4] : memref<8x16xf32, #tpu.memory_space<vmem>>, vector<8x16xf32>
    %cst = arith.constant dense<0.000000e+00> : vector<64x16xf32>
    %4 = tpu.matmul %2, %3, %cst {dimension_numbers = #tpu.dot_dimension_numbers<[1], [0], [0], [1], [0, 0, 1, 1], [], []>} : vector<64x8xf32>, vector<8x16xf32>, vector<64x16xf32> -> vector<64x16xf32>
    %c0_5 = arith.constant 0 : index
    %c0_6 = arith.constant 0 : index
    %5 = vector.load %arg3[%c0_5, %c0_6] : memref<1x16xf32, #tpu.memory_space<vmem>>, vector<1x16xf32>
    %6 = vector.broadcast %5 : vector<1x16xf32> to vector<64x16xf32>
    %7 = arith.addf %4, %6 : vector<64x16xf32>
    %8 = vector.shape_cast %7 : vector<64x16xf32> to vector<8x8x16xf32>
    %c0_7 = arith.constant 0 : index
    %c0_8 = arith.constant 0 : index
    %c0_9 = arith.constant 0 : index
    %c0_10 = arith.constant 0 : index
    %9 = vector.load %arg4[%c0_7, %c0_8, %c0_9, %c0_10] : memref<1x8x8x16xf32, #tpu.memory_space<vmem>>, vector<1x8x8x16xf32>
    %10 = vector.shape_cast %9 : vector<1x8x8x16xf32> to vector<8x8x16xf32>
    %11 = vector.shape_cast %8 : vector<8x8x16xf32> to vector<1x8x8x16xf32>
    tpu.vector_store %arg4[%c0_7, %c0_8, %c0_9, %c0_10], %11 {strides = array<i32>} : memref<1x8x8x16xf32, #tpu.memory_space<vmem>>, vector<1x8x8x16xf32>,
    return
  }
  func.func @transform_0(%arg0: i32) -> (i32, i32, i32, i32) {
    %c0_i32 = arith.constant 0 : i32
    %c0_i32_0 = arith.constant 0 : i32
    %c0_i32_1 = arith.constant 0 : i32
    %c0_i32_2 = arith.constant 0 : i32
    return %arg0, %c0_i32, %c0_i32_0, %c0_i32_1 : i32, i32, i32, i32
  }
  func.func @transform_1(%arg0: i32) -> (i32, i32) {
    %c0_i32 = arith.constant 0 : i32
    %c0_i32_0 = arith.constant 0 : i32
    %c0_i32_1 = arith.constant 0 : i32
    return %c0_i32, %c0_i32_0 : i32, i32
  }
  func.func @transform_2(%arg0: i32) -> (i32, i32) {
    %c0_i32 = arith.constant 0 : i32
    %c0_i32_0 = arith.constant 0 : i32
    %c0_i32_1 = arith.constant 0 : i32
    return %c0_i32, %c0_i32_0 : i32, i32
  }
  func.func @transform_3(%arg0: i32) -> (i32, i32, i32, i32) {
    %c0_i32 = arith.constant 0 : i32
    %c0_i32_0 = arith.constant 0 : i32
    %c0_i32_1 = arith.constant 0 : i32
    %c0_i32_2 = arith.constant 0 : i32
    return %arg0, %c0_i32, %c0_i32_0, %c0_i32_1 : i32, i32, i32, i32
  }
}

</mosaic_0001>

<bundles_post_ra>
// kernel: tpu_custom_call.1
= control target key start
LH: loop header
LB: loop body
LE: loop exit
PB: predicated region body
PF: predicated region fallthrough
CT: control target
= control target key end

     0   :  { %8 = vsyncpa [#allocation3], 0  ;;  %s922_s0 = inlined_call_operand.hbm [shape: f32[2,8,8,8], index: 0, kind: input, shape index: {}]   ;;  %s923_s1 = inlined_call_operand.hbm [shape: f32[8,16], index: 1, kind: input, shape index: {}]   ;;  %s924_s2 = inlined_call_operand.vmem [shape: f32[1,16], index: 2, kind: input, shape index: {}]   ;;  %s925_s3 = inlined_call_operand.hbm [shape: f32[2,8,8,16], index: 3, kind: output, shape index: {}]  }
   0x1   :  { %10 = vsyncpa [#allocation3 + $0x1], 0 }
   0x2   :  { %11 = vsyncpa [#allocation6], 0 }
   0x3   :  { %12 = vsyncpa [#allocation4], 0 }
   0x4   :  { %14 = vsyncpa [#allocation4 + $0x1], 0  ;;  %s718_s12 = smov 0   ;;  %s720_s13 = smov 0  }
   0x5   :  { %s722_s14 = smov 0   ;;  %s724_s15 = smov 0  }
   0x6 LB: > { %s739_s16 = sadd.s32 4294967295, %s689_s15   ;;  %s454_s17 = sadd.s32 4294967294, %s689_s15   ;;  %s689_s15 = sphi %s724_s15, %s948_s15   ;;  %s685_s14 = sphi %s722_s14, %s947_s14   ;;  %s681_s13 = sphi %s720_s13, %s946_s13   ;;  %s677_s12 = sphi %s718_s12, %s945_s12  }
   0x7   : > { %s743_s18 = sadd.s32 1, %s689_s15   ;;  %s27_s19 = sadd.s32 1, %s685_s14 }
   0x8   : > { %s24_s20 = ssub.s32 %s689_s15, %s743_s18  ;;  %p34_p0 = scmp.ne.s32.totalorder %s685_s14, %s681_s13 }
   0x9   : > { %p25_p1 = scmp.eq.s32.totalorder %s24_s20, 0  ;;  %p35_p2 = scmp.eq.s32.totalorder %s689_s15, 0 }
   0xa   : > { %p40_p3 = scmp.ne.s32.totalorder %s681_s13, %s677_s12  ;;  %p926_p4 = scmp.eq.s32.totalorder %s739_s16, 0 }
   0xb   : > { %s755_s21 = scalar_select %p25_p1, %s685_s14, %s27_s19  }
   0xc   : > { %p757_p5 = por %p35_p2, %p34_p0  ;;  %p763_p6 = por %p926_p4, %p40_p3 }
   0xd   : > { %p106_p7 = scmp.eq.s32.totalorder %s739_s16, 1  ;;  %p112_p8 = scmp.eq.s32.totalorder %s454_s17, 1 }
   0xe   : > { %s931_s23 = scalar_select %p763_p6, 1, 0 }
   0xf   : > { %p455_p9 = scmp.ge.s32.totalorder %s689_s15, 1  ;;  %p119_p10 = scmp.lt.s32.totalorder %s689_s15, 3 }
  0x10   : > { %p770_p11 = por %p106_p7, %p34_p0  ;;  %p774_p12 = por %p112_p8, %p40_p3 }
  0x11   : > { %p778_p13 = pnand %p455_p9, %p119_p10  ;;  %s691_s27 = smov [#allocation5]  }
  0x12   : > { %s932_s24 = scalar_select %p770_p11, 1, 0 }
  0x13   : > { %s933_s25 = scalar_select %p774_p12, 1, 0 }
  0x14   : > { %s934_s26 = scalar_select %p778_p13, 1, 0 }
  0x15   : > { %p514_p2 = pneg %p778_p13  ;;  %s132_s28 = sshll.u32 %s691_s27, 4  ;;  %s133_s28 = int_to_ptr.vmem [resolvable:$true] %s132_s28 }
  0x16   : > { %p527_p4 = scmp.lt.s32.totalorder %s689_s15, 2  ;;  %p935_p0 = scmp.eq.s32.totalorder %s739_s16, 0 }
  0x17   : > { %s146_s30 = sand.u32 1, %s685_s14   ;;  %s578_s6 = scalar_lea.vmem %s133_s28, 128 }
  0x18   : > { %p788_p7 = pnand %p514_p2, %p935_p0  ;;  %p795_p3 = pnand %p527_p4, %p757_p5 }
  0x19   : > { %s458_s5 = sshll.u32 %s146_s30, 6  ;;  %p579_p9 = scmp.ne.s32.totalorder %s133_s28, %s578_s6 }
  0x1a   : > { %p569_p8 = pneg %p788_p7  ;;  %p586_p12 = scmp.lt.s32.totalorder %s133_s28, %s133_s28 }
  0x1b   : > { %p587_p11 = scmp.lt.s32.totalorder %s578_s6, %s578_s6 }
  0x1c   : > { %p581_p10 = pnand %p579_p9, %p569_p8 }
  0x1d   : > { %p588_p2 = por %p587_p11, %p586_p12 }
  0x1e   : > { %p582_p1 = pneg %p581_p10 }
  0x20   : > { %p589_p0 = pnand %p588_p2, %p582_p1 }
  0x22   : > { %592 = shalt.err (!%p589_p0)
}
  0x23   : > { %517 = dma.hbm_to_vmem [thread:$0]  (!%p788_p7), %s923_s1, 128, %s133_s28, [#allocation6]  }
  0x24   : > { %s479_s9 = sshll.u32 %s689_s15, 10  ;;  %s150_s10 = scalar_lea.vmem [#allocation2], %s458_s5 }
  0x25   : > { %s157_s11 = sshll.u32 %s150_s10, 4  ;;  %s810_s20 = scalar_lea.hbm %s922_s0, %s479_s9  ;;  %s812_s11 = int_to_ptr.vmem [resolvable:$true] %s157_s11 }
  0x26   : > { %s814_s22 = scalar_lea.sflag [#allocation3], %s146_s30  ;;  %s593_s27 = scalar_lea.hbm %s810_s20, 1024 }
  0x27   : > { %p594_p4 = scmp.ne.s32.totalorder %s810_s20, %s593_s27  ;;  %p595_p5 = pneg %p795_p3 }
  0x28   : > { %s598_s5 = scalar_lea.hbm %s922_s0, 2048  ;;  %p599_p1 = scmp.lt.s32.totalorder %s810_s20, %s922_s0 }
  0x29   : > { %p596_p11 = pnand %p595_p5, %p594_p4  ;;  %p600_p7 = scmp.lt.s32.totalorder %s598_s5, %s593_s27 }
  0x2b   : > { %p597_p12 = pneg %p596_p11  ;;  %p601_p8 = por %p600_p7, %p599_p1 }
  0x2d   : > { %p602_p9 = pnand %p601_p8, %p597_p12 }
  0x2f   : > { %605 = shalt.err (!%p602_p9)
}
  0x30   : > { %s606_s30 = scalar_lea.vmem %s812_s11, 1024  ;;  %s692_s8 = smov [#allocation2]  }
  0x31   : > { %p607_p10 = scmp.ne.s32.totalorder %s812_s11, %s606_s30  ;;  %s611_s9 = sshll.u32 %s692_s8, 4  ;;  %s612_s9 = int_to_ptr.vmem [resolvable:$false] %s611_s9 }
  0x32   : > { %s613_s10 = scalar_lea.vmem %s612_s9, 2048  ;;  %p614_p4 = scmp.lt.s32.totalorder %s812_s11, %s612_s9 }
  0x33   : > { %p609_p2 = pnand %p607_p10, %p595_p5  ;;  %p615_p11 = scmp.lt.s32.totalorder %s613_s10, %s606_s30 }
  0x35   : > { %p610_p0 = pneg %p609_p2  ;;  %p616_p6 = por %p615_p11, %p614_p4 }
  0x37   : > { %p617_p13 = pnand %p616_p6, %p610_p0 }
  0x39   : > { %620 = shalt.err (!%p617_p13)
}
  0x3a   : > { %s693_s17 = smov 128   ;;  %s694_s19 = smov 8  }
  0x3b   : > { %521 = dma.hbm_to_vmem [thread:$0]  (!%p795_p3), %s810_s20, 1024, %s812_s11, %s814_s22, %s693_s17, %s693_s17, %s694_s19  }
  0x3c   : > { %p938_p5 = scmp.ne.s32.totalorder %s934_s26, 0 }
  0x3d   : > { %s838_s27 = sand.u32 (!%p938_p5), 1, %s681_s13   ;;  %p939_p6 = scmp.ne.s32.totalorder (!%p938_p5), %s931_s23, 0 }
  0x3e   : > { %169 = sbr.rel (%p938_p5) target bundleno = 290 (0x122), region = 32  ;;  %s462_s28 = sshll.u32 (!%p938_p5), %s838_s27, 6 }
  0x3f   : > { %s172_s29 = scalar_lea.sflag (!%p938_p5), [#allocation3], %s838_s27  ;;  %s175_s5 = scalar_lea.vmem (!%p938_p5), [#allocation2], %s462_s28 }
  0x43   : > { %664 = dma.done.wait (%p939_p6), %s172_s29, 1024  }
  0x44   : > { %666 = vsyncadd (%p939_p6), %s172_s29, 4294966272  ;;  %p940_p13 = scmp.eq.s32.totalorder %s739_s16, 0 }
  0x46   : > { %668 = dma.done.wait (%p940_p13), [#allocation6], 128   ;;  %p941_p3 = pmov %p940_p13 }
  0x47   : > { %v210_v0 = vld [vmem:[#allocation5] sm:$0xff]  ;;  %vm218_vm0 = vcmask 64512   ;;  %v203_v3 = vld [vmem:[%s175_s5 + $0x8] sm:$0xff]  ;;  %v204_v5 = vld [vmem:[%s175_s5 + $0x10] sm:$0xff]  ;;  %vm348_vm1 = vcmask 130048   ;;  %s201_s4 = scalar_lea.vmem [#allocation7], %s462_s28 }
  0x48   : > { %670 = vsyncadd (%p941_p3), [#allocation6], 4294967168  ;;  %v202_v1 = vld [vmem:[%s175_s5] sm:$0xff]  ;;  %490 = vmatprep.subr.mxu0 %v210_v0  ;;  %504 = vmatprep.subr.mxu1 %v210_v0  ;;  %v207_v4 = vld [vmem:[%s175_s5 + $0x28] sm:$0xff]  ;;  %s480_s11 = sshll.u32 %s739_s16, 10  ;;  %s371_s20 = sshll.u32 %s201_s4, 4  ;;  %s875_s20 = int_to_ptr.vmem [resolvable:$true] %s371_s20 }
  0x49   : > { %v206_v2 = vld [vmem:[%s175_s5 + $0x20] sm:$0xff]  ;;  %491 = vmatpush3.msra.mxu0 %v210_v0  ;;  %505 = vmatpush3.msra.mxu1 %v210_v0  ;;  %v208_v6 = vld [vmem:[%s175_s5 + $0x30] sm:$0xff]  ;;  %v205_v7 = vld [vmem:[%s175_s5 + $0x18] sm:$0xff]  ;;  %s873_s7 = scalar_lea.hbm %s925_s3, %s480_s11  ;;  %s358_s16 = scalar_lea.sflag [#allocation4], %s838_s27 }
  0x4a   : > { %492 = vmatprep.mubr.msk.f32.mxu0 %vm218_vm0, %v202_v1  ;;  %498 = vmatprep.mubr.msk.f32.mxu1 %vm218_vm0, %v206_v2  ;;  %v209_v8 = vld [vmem:[%s175_s5 + $0x38] sm:$0xff]  ;;  %v465_v9 = vld [vmem:[%s924_s2] ss:$0 sm:$0xff]  ;;  %s621_s30 = scalar_lea.vmem %s875_s20, 1024  ;;  %p942_p1 = scmp.ne.s32.totalorder %s932_s24, 0 }
  0x4b   : > { %493 = vmatmul.mubr.msk.f32.vlgmr.msra.gmra.mxu0 %vm218_vm0, %v203_v3  ;;  %499 = vmatmul.mubr.msk.f32.vlgmr.msra.gmra.mxu1 %vm218_vm0, %v207_v4  ;;  %p622_p12 = scmp.ne.s32.totalorder %s875_s20, %s621_s30  ;;  %s695_s8 = smov [#allocation7]  }
  0x4c   : > { %495 = vmatprep.mubr.msk.f32.mxu0 %vm218_vm0, %v204_v5  ;;  %501 = vmatprep.mubr.msk.f32.mxu1 %vm218_vm0, %v208_v6  ;;  %s625_s9 = sshll.u32 %s695_s8, 4  ;;  %s626_s9 = int_to_ptr.vmem [resolvable:$false] %s625_s9 }
  0x4d   : > { %p623_p7 = pnand %p622_p12, %p942_p1  ;;  %s627_s10 = scalar_lea.vmem %s626_s9, 2048 }
  0x4e   : > { %p628_p9 = scmp.lt.s32.totalorder %s875_s20, %s626_s9  ;;  %p629_p10 = scmp.lt.s32.totalorder %s627_s10, %s621_s30 }
  0x4f   : > { %496 = vmatmul.mubr.msk.f32.gmra.mxu0 %vm218_vm0, %v205_v7  ;;  %502 = vmatmul.mubr.msk.f32.gmra.mxu1 %vm218_vm0, %v209_v8  ;;  %p624_p8 = pneg %p623_p7 }
  0x50   : > { %p630_p2 = por %p629_p10, %p628_p9 }
  0x52   : > { %p631_p0 = pnand %p630_p2, %p624_p8 }
 0x10b   : > { %v494_v10 = vpop.f32.mrf.mxu0  ;;  %v500_v11 = vpop.f32.mrf.mxu1 }
 0x10c   : > { %v315_v12 = vadd.f32 %v494_v10, %v465_v9  ;;  %v335_v13 = vadd.f32 %v500_v11, %v465_v9 }
 0x10d   : > { %v309_v14 = vpop.f32.mrf.mxu0  ;;  %v329_v15 = vpop.f32.mrf.mxu1 }
 0x10e   : > { %350 = vst.msk [vmem:[%s201_s4 + $0x8] sm:$0xff] %vm348_vm1, %v315_v12  ;;  %354 = vst.msk [vmem:[%s201_s4 + $0x28] sm:$0xff] %vm348_vm1, %v335_v13  ;;  %v310_v16 = vadd.f32 %v465_v9, %v309_v14  ;;  %v330_v17 = vadd.f32 %v465_v9, %v329_v15 }
 0x10f   : > { %v497_v18 = vpop.f32.mrf.mxu0  ;;  %v503_v19 = vpop.f32.mrf.mxu1 }
 0x110   : > { %349 = vst.msk [vmem:[%s201_s4] sm:$0xff] %vm348_vm1, %v310_v16  ;;  %353 = vst.msk [vmem:[%s201_s4 + $0x20] sm:$0xff] %vm348_vm1, %v330_v17  ;;  %v325_v20 = vadd.f32 %v497_v18, %v465_v9  ;;  %v345_v21 = vadd.f32 %v503_v19, %v465_v9 }
 0x111   : > { %v319_v22 = vpop.f32.mrf.mxu0  ;;  %v339_v23 = vpop.f32.mrf.mxu1 }
 0x112   : > { %352 = vst.msk [vmem:[%s201_s4 + $0x18] sm:$0xff] %vm348_vm1, %v325_v20  ;;  %356 = vst.msk [vmem:[%s201_s4 + $0x38] sm:$0xff] %vm348_vm1, %v345_v21  ;;  %v320_v24 = vadd.f32 %v465_v9, %v319_v22  ;;  %v340_v25 = vadd.f32 %v465_v9, %v339_v23 }
 0x114   : > { %351 = vst.msk [vmem:[%s201_s4 + $0x10] sm:$0xff] %vm348_vm1, %v320_v24  ;;  %355 = vst.msk [vmem:[%s201_s4 + $0x30] sm:$0xff] %vm348_vm1, %v340_v25 }
 0x115   : > { %634 = shalt.err (!%p631_p0)
}
 0x116   : > { %s635_s17 = scalar_lea.hbm %s873_s7, 1024  ;;  %s639_s29 = scalar_lea.hbm %s925_s3, 2048 }
 0x117   : > { %p636_p4 = scmp.ne.s32.totalorder %s873_s7, %s635_s17  ;;  %p640_p6 = scmp.lt.s32.totalorder %s873_s7, %s925_s3 }
 0x118   : > { %p641_p13 = scmp.lt.s32.totalorder %s639_s29, %s635_s17 }
 0x119   : > { %p637_p11 = pnand %p636_p4, %p942_p1 }
 0x11a   : > { %p642_p3 = por %p641_p13, %p640_p6 }
 0x11b   : > { %p638_p5 = pneg %p637_p11 }
 0x11d   : > { %p643_p12 = pnand %p642_p3, %p638_p5 }
 0x11f   : > { %646 = shalt.err (!%p643_p12)
}
 0x120   : > { %s696_s26 = smov 128   ;;  %s697_s4 = smov 8  }
 0x121   : > { %512 = dma.vmem_to_hbm [thread:$0]  (%p942_p1), %s875_s20, 1024, %s873_s7, %s358_s16, %s696_s26, %s696_s26, %s697_s4  }
 0x122 PF: > { %s386_s11 = sand.u32 1, %s677_s12   ;;  %p943_p7 = scmp.ne.s32.totalorder %s933_s25, 0 }
 0x123   : > { %p944_p8 = scmp.ge.s32.totalorder %s689_s15, 2  ;;  %s387_s22 = scalar_lea.sflag [#allocation4], %s386_s11 }
 0x125   : > { %p523_p9 = pnand %p944_p8, %p943_p7 }
 0x127   : > { %p524_p10 = pneg %p523_p9 }
 0x129   : > { %672 = dma.done.wait (%p524_p10), %s387_s22, 1024  }
 0x12a   : > { %674 = vsyncadd (%p524_p10), %s387_s22, 4294966272  ;;  %p17_p2 = scmp.ge.s32.totalorder %s743_s18, 4   ;;  %s945_s12 = smov %s681_s13 }
 0x12b   : > { %s946_s13 = smov %s685_s14  ;;  %s947_s14 = smov %s755_s21 }
 0x12c   : > { %s948_s15 = smov %s743_s18  ;;  %19 = sbr.rel (!%p17_p2) target bundleno = 6 (0x6), region = 81 }
 0x131   :  { %392 = vsyncpa [#allocation3], 1 }
 0x132   :  { %394 = vsyncpa [#allocation3 + $0x1], 1 }
 0x133   :  { %395 = vsyncpa [#allocation6], 1 }
 0x134   :  { %396 = vsyncpa [#allocation4], 1 }
 0x135   :  { %398 = vsyncpa [#allocation4 + $0x1], 1 }

</bundles_post_ra>
